<compile_context>
chip_gen: v7x
topology: tpu7x:2x2x1
jax: 0.10.0
libtpu: 0.0.40
codegen_flags: <defaults>
</compile_context>

<pallas_src>
import functools

import jax
import jax.numpy as jnp
from jax import lax
from jax.experimental import pallas as pl
from jax.experimental.pallas import tpu as pltpu


def _attn_mask_kernel(x_ref, mt_ref, u_ref, o_ref, *, tq, s_valid):
    # x_ref: (C, S_pad)  [batch dim squeezed by BlockSpec]
    # mt_ref: (C, C) = scale * Wk^T Wq ; u_ref: (C, 1) = scale * Wk^T bq
    # o_ref: (TQ, S_pad)
    qi = pl.program_id(1)

    x = x_ref[...].astype(jnp.float32)                                   # (C, S)

    # q'_i = M^T x_i + u  (all conv weights/biases/scale folded host-side;
    # terms constant along the key axis were dropped — they cancel in softmax).
    start = pl.multiple_of(qi * tq, 128)
    xq = x_ref[:, pl.ds(start, tq)].astype(jnp.float32)                  # (C, TQ)
    qT = jnp.dot(mt_ref[...], xq, preferred_element_type=jnp.float32) + u_ref[...]

    # dots[i, j] = q'_i . x_j  -> contract dim 0 of both operands.
    dots = lax.dot_general(qT, x, dimension_numbers=(((0,), (0,)), ((), ())),
                           preferred_element_type=jnp.float32)           # (TQ, S)

    if s_valid < dots.shape[-1]:
        # Static branch: only emitted when S was padded up to a 128 multiple.
        key_idx = lax.broadcasted_iota(jnp.int32, dots.shape, 1)
        dots = jnp.where(key_idx < s_valid, dots, -1e30)

    # Numerically-stable softmax over the key (lane) axis.
    m = jnp.max(dots, axis=-1, keepdims=True)
    e = jnp.exp(dots - m)
    denom = jnp.sum(e, axis=-1, keepdims=True)
    o_ref[...] = (e * pl.reciprocal(denom, approx=False)).astype(o_ref.dtype)


def _vmem_budgets():
    """(vmem_limit_bytes, per-step working-set budget) for the local TPU gen."""
    try:
        cap = pltpu.get_tpu_info().vmem_capacity_bytes
    except Exception:  # CPU / interpret fallback or API mismatch: be conservative.
        cap = 64 * 1024 * 1024
    if cap >= 100 * 1024 * 1024:                 # v5e / v6e: 128 MiB physical VMEM
        return 96 * 1024 * 1024, 64 * 1024 * 1024
    return 48 * 1024 * 1024, 32 * 1024 * 1024    # v7x: 64 MiB physical VMEM


def _pick_tq(s_pad, c, out_isz, in_isz, tile_budget, max_tq=2048):
    """Largest query tile TQ (multiple of 128, dividing s_pad) whose estimated
    per-step VMEM footprint stays inside `tile_budget`."""
    def peak(tq):
        return (2 * tq * s_pad * out_isz       # double-buffered output block
                + 3 * tq * s_pad * 4           # f32 temps: dots, e, normalized
                + 2 * c * s_pad * in_isz)      # double-buffered x block
    best = 128
    tq = 128
    while tq <= min(s_pad, max_tq):
        if s_pad % tq == 0 and peak(tq) <= tile_budget:
            best = tq
        tq += 128
    return best


def get_self_attention_mask(x_nchw, conv_w, conv_b, *, tq=None, out_dtype=None):
    """x_nchw: (B, C, H, W); conv_w: (2C, C, 1, 1); conv_b: (2C,).
    Returns the (B, HW, HW) softmax attention map.
    Pass out_dtype=jnp.bfloat16 in production: halves the dominant S^2 writeback."""
    B, C, H, W = x_nchw.shape
    S = H * W
    assert conv_w.shape == (2 * C, C, 1, 1)
    assert conv_b.shape == (2 * C,)
    out_dtype = x_nchw.dtype if out_dtype is None else jnp.dtype(out_dtype)

    # ---- Host-side algebra (f32): fold scale, k-projection and surviving bias.
    w2d = conv_w[:, :, 0, 0].astype(jnp.float32)          # (2C, C) = (out_ch, in_ch)
    wq, wk = w2d[:C], w2d[C:]
    bq = conv_b[:C].astype(jnp.float32)
    scale = float(C) ** -0.5
    mt = scale * (wk.T @ wq)                               # (C, C)  = M^T
    u = (scale * (wk.T @ bq)).reshape(C, 1)                # (C, 1)
    # bk is dropped: q_i . bk is constant along keys -> cancels in the softmax.

    # ---- Free reshape NCHW -> (B, C, S); keep native dtype; pad S to 128-lane.
    x = x_nchw.reshape(B, C, S)
    S_pad = max(128, ((S + 127) // 128) * 128)
    if S_pad != S:
        x = jnp.pad(x, ((0, 0), (0, 0), (0, S_pad - S)))

    vmem_limit, tile_budget = _vmem_budgets()
    if tq is None:
        tq = _pick_tq(S_pad, C, out_dtype.itemsize, jnp.dtype(x.dtype).itemsize,
                      tile_budget)
    assert tq % 128 == 0 and S_pad % tq == 0, (
        f"query tile {tq} must be a multiple of 128 dividing S_pad={S_pad}")

    kernel = functools.partial(_attn_mask_kernel, tq=tq, s_valid=S)

    out = pl.pallas_call(
        kernel,
        out_shape=jax.ShapeDtypeStruct((B, S_pad, S_pad), out_dtype),
        grid_spec=pltpu.PrefetchScalarGridSpec(
            num_scalar_prefetch=0,
            grid=(B, S_pad // tq),
            in_specs=[
                pl.BlockSpec((None, C, S_pad), lambda b, qi: (b, 0, 0)),  # x
                pl.BlockSpec((C, C), lambda b, qi: (0, 0)),               # MT
                pl.BlockSpec((C, 1), lambda b, qi: (0, 0)),               # u
            ],
            out_specs=pl.BlockSpec((None, tq, S_pad), lambda b, qi: (b, qi, 0)),
        ),
        compiler_params=pltpu.CompilerParams(
            # Every grid step is independent -> both axes parallel (megacore).
            dimension_semantics=("parallel", "parallel"),
            vmem_limit_bytes=vmem_limit,
        ),
    )(x, mt, u)

    if S_pad != S:
        out = out[:, :S, :S]
    return out


def _reference(x_nchw, conv_w, conv_b):
    """Pure-JAX reference mirroring the PyTorch forward."""
    B, C, H, W = x_nchw.shape
    S = H * W
    w2d = conv_w[:, :, 0, 0]                       # (2C, C)
    qk = jnp.einsum("oc,bchw->bohw", w2d, x_nchw) + conv_b[None, :, None, None]
    q = qk[:, :C].transpose(0, 2, 3, 1).reshape(B, S, C)
    k = qk[:, C:].transpose(0, 2, 3, 1).reshape(B, S, C)
    dots = jnp.einsum("bsc,btc->bst", q, k) * (float(C) ** -0.5)
    return jax.nn.softmax(dots, axis=-1)


if __name__ == "__main__":
    B, C, H, W = 2, 4, 16, 16
    key = jax.random.PRNGKey(0)
    kx, kw, kb = jax.random.split(key, 3)

    x = jax.random.normal(kx, (B, C, H, W), dtype=jnp.float32)
    # Deterministic synthetic conv parameters (matches Conv2d(C, 2C, 1) shapes).
    conv_w = jax.random.normal(kw, (2 * C, C, 1, 1), dtype=jnp.float32) * (1.0 / C)
    conv_b = jax.random.normal(kb, (2 * C,), dtype=jnp.float32) * 0.1

    ref = _reference(x, conv_w, conv_b)

    # 1) f32 output, explicit tq=128 -> grid (2, 2): exercises multi-step tiling.
    attn = jax.block_until_ready(get_self_attention_mask(x, conv_w, conv_b, tq=128))
    assert attn.shape == (B, H * W, H * W)
    assert jnp.allclose(attn, ref, atol=1e-5, rtol=1e-5), "f32 mismatch vs reference"
    assert jnp.allclose(jnp.sum(attn, axis=-1), 1.0, atol=1e-5), "rows must sum to 1"

    # 2) bf16 output (recommended in production: halves the S^2 HBM writeback).
    attn_bf16 = jax.block_until_ready(
        get_self_attention_mask(x, conv_w, conv_b, out_dtype=jnp.bfloat16))
    assert jnp.allclose(attn_bf16.astype(jnp.float32), ref, atol=1e-2, rtol=1e-2), \
        "bf16 mismatch vs reference"

    # 3) Non-128 spatial size (S = 14*14 = 196): exercises lane padding + key mask.
    x2 = jax.random.normal(kx, (1, 4, 14, 14), dtype=jnp.float32)
    cw2 = jax.random.normal(kw, (8, 4, 1, 1), dtype=jnp.float32) * 0.25
    cb2 = jax.random.normal(kb, (8,), dtype=jnp.float32) * 0.1
    attn2 = jax.block_until_ready(get_self_attention_mask(x2, cw2, cb2))
    ref2 = _reference(x2, cw2, cb2)
    assert attn2.shape == (1, 196, 196)
    assert jnp.allclose(attn2, ref2, atol=1e-5, rtol=1e-5), "padded mismatch vs reference"

    print("KERNEL_OK")
</pallas_src>

<mosaic_0001>
module attributes {stable_mosaic.version = 11 : i64} {
  func.func @_attn_mask_kernel(%arg0: i32, %arg1: i32, %arg2: memref<1x4x256xf32, #tpu.memory_space<vmem>>, %arg3: memref<4x4xf32, #tpu.memory_space<vmem>>, %arg4: memref<4x1xf32, #tpu.memory_space<vmem>>, %arg5: memref<1x128x256xf32, #tpu.memory_space<vmem>>) attributes {dimension_semantics = [#tpu.dimension_semantics<parallel>, #tpu.dimension_semantics<parallel>], iteration_bounds = array<i64: 2, 2>, scalar_prefetch = 0 : i64, scratch_operands = 0 : i64, tpu.core_type = #tpu.core_type<tc>, window_params = [{transform_indices = @transform_0, window_bounds = array<i64: 1, 4, 256>}, {pipeline_mode = #tpu.pipeline_mode<synchronous>, transform_indices = @transform_1, window_bounds = array<i64: 4, 4>}, {pipeline_mode = #tpu.pipeline_mode<synchronous>, transform_indices = @transform_2, window_bounds = array<i64: 4, 1>}, {transform_indices = @transform_3, window_bounds = array<i64: 1, 128, 256>}]} {
    %c0 = arith.constant 0 : index
    %c0_0 = arith.constant 0 : index
    %c0_1 = arith.constant 0 : index
    %0 = vector.load %arg2[%c0, %c0_0, %c0_1] : memref<1x4x256xf32, #tpu.memory_space<vmem>>, vector<1x4x256xf32>
    %1 = vector.shape_cast %0 : vector<1x4x256xf32> to vector<4x256xf32>
    %c128_i32 = arith.constant 128 : i32
    %2 = arith.muli %arg1, %c128_i32 : i32
    %3 = tpu.assume_multiple %2, 128 : i32
    %c0_2 = arith.constant 0 : index
    %c0_3 = arith.constant 0 : index
    %4 = arith.index_cast %3 : i32 to index
    %5 = vector.load %arg2[%c0_2, %c0_3, %4] : memref<1x4x256xf32, #tpu.memory_space<vmem>>, vector<1x4x128xf32>
    %6 = vector.shape_cast %5 : vector<1x4x128xf32> to vector<4x128xf32>
    %c0_4 = arith.constant 0 : index
    %c0_5 = arith.constant 0 : index
    %7 = vector.load %arg3[%c0_4, %c0_5] : memref<4x4xf32, #tpu.memory_space<vmem>>, vector<4x4xf32>
    %cst = arith.constant dense<0.000000e+00> : vector<4x128xf32>
    %8 = tpu.matmul %7, %6, %cst {dimension_numbers = #tpu.dot_dimension_numbers<[1], [0], [0], [1], [0, 0, 1, 1], [], []>} : vector<4x4xf32>, vector<4x128xf32>, vector<4x128xf32> -> vector<4x128xf32>
    %c0_6 = arith.constant 0 : index
    %c0_7 = arith.constant 0 : index
    %9 = vector.load %arg4[%c0_6, %c0_7] : memref<4x1xf32, #tpu.memory_space<vmem>>, vector<4x1xf32>
    %10 = vector.broadcast %9 : vector<4x1xf32> to vector<4x128xf32>
    %11 = arith.addf %8, %10 : vector<4x128xf32>
    %cst_8 = arith.constant dense<0.000000e+00> : vector<128x256xf32>
    %12 = tpu.matmul %11, %1, %cst_8 {dimension_numbers = #tpu.dot_dimension_numbers<[0], [0], [1], [1], [0, 1, 1, 1], [], []>} : vector<4x128xf32>, vector<4x256xf32>, vector<128x256xf32> -> vector<128x256xf32>
    %cst_9 = arith.constant dense<0xFF800000> : vector<128xf32>
    %13 = vector.multi_reduction <maximumf>, %12, %cst_9 [1] : vector<128x256xf32> to vector<128xf32>
    %14 = vector.shape_cast %13 : vector<128xf32> to vector<128x1xf32>
    %15 = vector.broadcast %14 : vector<128x1xf32> to vector<128x256xf32>
    %16 = arith.subf %12, %15 : vector<128x256xf32>
    %17 = math.exp %16 : vector<128x256xf32>
    %cst_10 = arith.constant dense<0.000000e+00> : vector<128xf32>
    %18 = vector.multi_reduction <add>, %17, %cst_10 [1] : vector<128x256xf32> to vector<128xf32>
    %19 = vector.shape_cast %18 : vector<128xf32> to vector<128x1xf32>
    %20 = tpu.reciprocal %19 : vector<128x1xf32> -> vector<128x1xf32>
    %21 = vector.broadcast %20 : vector<128x1xf32> to vector<128x256xf32>
    %22 = arith.mulf %17, %21 : vector<128x256xf32>
    %c0_11 = arith.constant 0 : index
    %c0_12 = arith.constant 0 : index
    %c0_13 = arith.constant 0 : index
    %23 = vector.load %arg5[%c0_11, %c0_12, %c0_13] : memref<1x128x256xf32, #tpu.memory_space<vmem>>, vector<1x128x256xf32>
    %24 = vector.shape_cast %23 : vector<1x128x256xf32> to vector<128x256xf32>
    %25 = vector.shape_cast %22 : vector<128x256xf32> to vector<1x128x256xf32>
    tpu.vector_store %arg5[%c0_11, %c0_12, %c0_13], %25 {strides = array<i32>} : memref<1x128x256xf32, #tpu.memory_space<vmem>>, vector<1x128x256xf32>,
    return
  }
  func.func @transform_0(%arg0: i32, %arg1: i32) -> (i32, i32, i32) {
    %c0_i32 = arith.constant 0 : i32
    %c0_i32_0 = arith.constant 0 : i32
    %c0_i32_1 = arith.constant 0 : i32
    return %arg0, %c0_i32, %c0_i32_0 : i32, i32, i32
  }
  func.func @transform_1(%arg0: i32, %arg1: i32) -> (i32, i32) {
    %c0_i32 = arith.constant 0 : i32
    %c0_i32_0 = arith.constant 0 : i32
    %c0_i32_1 = arith.constant 0 : i32
    return %c0_i32, %c0_i32_0 : i32, i32
  }
  func.func @transform_2(%arg0: i32, %arg1: i32) -> (i32, i32) {
    %c0_i32 = arith.constant 0 : i32
    %c0_i32_0 = arith.constant 0 : i32
    %c0_i32_1 = arith.constant 0 : i32
    return %c0_i32, %c0_i32_0 : i32, i32
  }
  func.func @transform_3(%arg0: i32, %arg1: i32) -> (i32, i32, i32) {
    %c0_i32 = arith.constant 0 : i32
    %c0_i32_0 = arith.constant 0 : i32
    return %arg0, %arg1, %c0_i32 : i32, i32, i32
  }
}

</mosaic_0001>

<bundles_post_ra>
// kernel: tpu_custom_call.1
= control target key start
LH: loop header
LB: loop body
LE: loop exit
PB: predicated region body
PF: predicated region fallthrough
CT: control target
= control target key end

     0   :  { %8 = vsyncpa [#allocation3], 0  ;;  %s1913_s0 = inlined_call_operand.hbm [shape: f32[2,4,256], index: 0, kind: input, shape index: {}]   ;;  %s1914_s1 = inlined_call_operand.vmem [shape: f32[4,4], index: 1, kind: input, shape index: {}]   ;;  %s1915_s2 = inlined_call_operand.vmem [shape: f32[4,1], index: 2, kind: input, shape index: {}]   ;;  %s1916_s3 = inlined_call_operand.hbm [shape: f32[2,256,256], index: 3, kind: output, shape index: {}]  }
   0x1   :  { %10 = vsyncpa [#allocation3 + $0x1], 0 }
   0x2   :  { %11 = vsyncpa [#allocation4], 0 }
   0x3   :  { %13 = vsyncpa [#allocation4 + $0x1], 0  ;;  %s1355_s12 = smov 0   ;;  %s1357_s13 = smov 0  }
   0x4   :  { %s1359_s14 = smov 0   ;;  %s1361_s15 = smov 0  }
   0x5   :  { %s1363_s16 = smov 0   ;;  %s1365_s17 = smov 0  }
   0x6   :  { %s1367_s18 = smov 0   ;;  %s1369_s19 = smov 0  }
   0x7   :  { %s1371_s20 = smov 0   ;;  %s1373_s21 = smov 0  }
   0x8   :  { %s1375_s22 = smov 0  }
   0x9 LB: > { %s919_s23 = sadd.s32 4294967295, %s1326_s22   ;;  %s920_s24 = sadd.s32 4294967294, %s1326_s22   ;;  %s1326_s22 = sphi %s1375_s22, %s19_s22   ;;  %s1322_s21 = sphi %s1373_s21, %s1939_s21   ;;  %s1318_s20 = sphi %s1371_s20, %s1938_s20   ;;  %s1314_s19 = sphi %s1369_s19, %s1937_s19   ;;  %s1310_s18 = sphi %s1367_s18, %s1936_s18   ;;  %s1306_s17 = sphi %s1365_s17, %s1935_s17   ;;  %s1302_s16 = sphi %s1363_s16, %s1934_s16   ;;  %s1298_s15 = sphi %s1361_s15, %s1933_s15   ;;  %s1294_s14 = sphi %s1359_s14, %s1932_s14   ;;  %s1290_s13 = sphi %s1357_s13, %s1931_s13   ;;  %s1286_s12 = sphi %s1355_s12, %s1930_s12  }
   0xa   : > { %s28_s25 = sadd.s32 1, %s1318_s20  ;;  %s31_s26 = sadd.s32 1, %s1322_s21 }
   0xb   : > { %p29_p0 = scmp.ge.s32.totalorder %s28_s25, 2  ;;  %s38_s27 = sadd.s32 1, %s1306_s17 }
   0xc   : > { %p45_p1 = scmp.ne.s32.totalorder %s1306_s17, %s1302_s16  ;;  %p46_p2 = scmp.eq.s32.totalorder %s1326_s22, 0 }
   0xd   : > { %s1941_s25 = smov (%p29_p0, %s28_s25), 0  ;;  %s1943_s26 = smov (!%p29_p0, %s31_s26), %s1322_s21 }
   0xe   : > { %p1419_p3 = por %p46_p2, %p45_p1  ;;  %p51_p4 = scmp.ne.s32.totalorder %s1302_s16, %s1298_s15 }
   0xf   : > { %p33_p5 = scmp.ge.s32.totalorder %s1943_s26, 2  ;;  %p52_p6 = scmp.eq.s32.totalorder %s919_s23, 0 }
  0x10   : > { %s104_s29 = ssub.s32 %s1318_s20, %s1941_s25  ;;  %s108_s30 = sadd.s32 1, %s1294_s14 }
  0x11   : > { %s1945_s26 = smov (%p33_p5, %s1943_s26), 0  ;;  %p1429_p7 = por %p52_p6, %p51_p4 }
  0x12   : > { %1920 = sst [smem:[#allocation8_spill]] %s1945_s26  ;;  %p118_p8 = scmp.ne.s32.totalorder %s1294_s14, %s1290_s13 }
  0x13   : > { %s35_s5 = ssub.s32 %s1322_s21, %s1945_s26  ;;  %p119_p9 = scmp.eq.s32.totalorder %s919_s23, 3 }
  0x14   : > { %p36_p10 = scmp.eq.s32.totalorder %s35_s5, 0  ;;  %s105_s6 = sor.u32 %s104_s29, %s35_s5 }
  0x15   : > { %p106_p11 = scmp.eq.s32.totalorder %s105_s6, 0  ;;  %p1437_p12 = por %p119_p9, %p118_p8 }
  0x16   : > { %s1442_s8 = scalar_select %p36_p10, %s1306_s17, %s38_s27  }
  0x17   : > { %s1922_s7 = scalar_select %p1437_p12, 1, 0 }
  0x18   : > { %s1445_s9 = scalar_select %p106_p11, %s1294_s14, %s108_s30  }
  0x19   : > { %p124_p13 = scmp.ne.s32.totalorder %s1290_s13, %s1286_s12  ;;  %p125_p0 = scmp.eq.s32.totalorder %s920_s24, 3 }
  0x1a   : > { %p981_p1 = scmp.lt.s32.totalorder %s1326_s22, 4  ;;  %s151_s11 = sand.u32 1, %s1306_s17  }
  0x1b   : > { %p1450_p2 = por %p125_p0, %p124_p13  ;;  %s923_s15 = sshll.u32 %s151_s11, 3 }
  0x1c   : > { %s958_s23 = sshll.u32 %s1322_s21, 7  ;;  %s155_s27 = scalar_lea.vmem [#allocation2], %s923_s15 }
  0x1d   : > { %s1923_s10 = scalar_select %p1450_p2, 1, 0 }
  0x1e   : > { %s1459_s6 = scalar_lea.hbm %s1913_s0, %s958_s23  ;;  %s163_s30 = sshll.u32 %s155_s27, 4  ;;  %s1461_s30 = int_to_ptr.vmem [resolvable:$true] %s163_s30 }
  0x1f   : > { %p1465_p4 = pnand %p981_p1, %p1419_p3  ;;  %s152_s29 = scalar_lea.sflag [#allocation3], %s151_s11 }
  0x20   : > { %s1174_s23 = scalar_lea.hbm %s1459_s6, 128  ;;  %s1179_s28 = scalar_lea.hbm %s1913_s0, 256 }
  0x21   : > { %p1175_p8 = scmp.ne.s32.totalorder %s1459_s6, %s1174_s23  ;;  %p1176_p9 = pneg %p1465_p4 }
  0x22   : > { %p1180_p3 = scmp.lt.u32.totalorder %s1459_s6, %s1913_s0  ;;  %p1181_p13 = scmp.lt.u32.totalorder %s1179_s28, %s1174_s23 }
  0x23   : > { %p1177_p10 = pnand %p1176_p9, %p1175_p8  ;;  %p1183_p1 = scmp.lt.u32.totalorder %s1174_s23, %s1459_s6 }
  0x24   : > { %p1182_p0 = por %p1181_p13, %p1180_p3 }
  0x25   : > { %p1178_p11 = pneg %p1177_p10 }
  0x26   : > { %p1184_p5 = por %p1183_p1, %p1182_p0 }
  0x28   : > { %p1185_p6 = pnand %p1184_p5, %p1178_p11 }
  0x2a   : > { %1188 = shalt.err (!%p1185_p6)
}
  0x2b   : > { %s1189_s11 = scalar_lea.vmem %s1461_s30, 128  ;;  %s1328_s15 = smov [#allocation2]  }
  0x2c   : > { %p1190_p8 = scmp.ne.s32.totalorder %s1461_s30, %s1189_s11  ;;  %s1194_s5 = sshll.u32 %s1328_s15, 4  ;;  %s1195_s5 = int_to_ptr.vmem [resolvable:$false] %s1194_s5 }
  0x2d   : > { %s1196_s26 = scalar_lea.vmem %s1195_s5, 256  ;;  %p1197_p12 = scmp.lt.s32.totalorder %s1461_s30, %s1195_s5 }
  0x2e   : > { %p1192_p10 = pnand %p1190_p8, %p1176_p9  ;;  %p1198_p3 = scmp.lt.s32.totalorder %s1196_s26, %s1189_s11 }
  0x30   : > { %p1193_p2 = pneg %p1192_p10  ;;  %p1199_p13 = por %p1198_p3, %p1197_p12 }
  0x32   : > { %p1200_p0 = pnand %p1199_p13, %p1193_p2 }
  0x34   : > { %1203 = shalt.err (!%p1200_p0)
}
  0x35   : > { %976 = dma.hbm_to_vmem [thread:$0]  (!%p1465_p4), %s1459_s6, 128, %s1461_s30, %s152_s29  }
  0x36   : > { %p1925_p5 = scmp.lt.s32.totalorder %s1326_s22, 5  ;;  %p1926_p6 = scmp.ge.s32.totalorder %s1326_s22, 1 }
  0x38   : > { %p169_p9 = pnand %p1926_p6, %p1925_p5 }
  0x39   : > { %s174_s23 = sand.u32 (!%p169_p9), 1, %s1302_s16  }
  0x3a   : > { %172 = sbr.rel (%p169_p9) target bundleno = 1020 (0x3fc), region = 32  ;;  %s927_s28 = sshll.u32 (!%p169_p9), %s174_s23, 3 }
  0x3b   : > { %s175_s27 = scalar_lea.sflag (!%p169_p9), [#allocation3], %s174_s23  ;;  %s178_s11 = scalar_lea.vmem (!%p169_p9), [#allocation2], %s927_s28 }
  0x41   : > { %1277 = dma.done.wait (%p1429_p7), %s175_s27, 128  }
  0x42   : > { %1279 = vsyncadd (%p1429_p7), %s175_s27, 4294967168  ;;  %s929_s24 = sshll.u32 %s1310_s18, 7  ;;  %v1329_v0 = vmov 0.0   ;;  %vm1330_vm0 = vmmov 0   ;;  %v1331_v1 = vmov 0   ;;  %vm220_vm1 = vcmask 1043456  }
  0x43   : > { %962 = vmatprep.subr.mxu0 %v1329_v0  ;;  %s204_s6 = sshra.s32 %s929_s24, 7  ;;  %964 = vmatprep.mubr.msk.f32.mxu0 %vm1330_vm0, %v1329_v0  ;;  %vm216_vm2 = vcmask 31744   ;;  %v209_v3 = vld [vmem:[%s1914_s1] sm:$0xf]  ;;  %s198_s23 = sand.u32 1, %s1290_s13  }
  0x44   : > { %s930_s30 = sshll.u32 %s204_s6, 2  ;;  %1076 = vset.pattern.permute.xlu0 %v1331_v1  ;;  %486 = vmatprep.mubr.f32.mxu1 %v1329_v0  ;;  %v210_v4 = vld [vmem:[%s1915_s2] sm:$0xf]  ;;  %s928_s28 = sshll.u32 %s198_s23, 8 }
  0x45   : > { %s207_s29 = scalar_lea.vmem %s178_s11, %s930_s30 [#allocation2]  ;;  %213 = vperm.xlu0 %1076, %v210_v4   ;;  %v202_v5 = vld [vmem:[%s178_s11] sm:$0xff]  ;;  %s1776_s27 = scalar_lea.vmem [#allocation5], %s928_s28 }
  0x46   : > { %v208_v2 = vld [vmem:[%s207_s29] sm:$0xf]  ;;  %v327_v6 = vcombine.high %v202_v5, %v202_v5  ;;  %s959_s11 = sshll.u32 %s1310_s18, 5  ;;  %s954_s24 = sshll.u32 %s1314_s19, 6 }
  0x47   : > { %963 = vmatpush3.msk.msra.mxu0 %vm220_vm1, %v208_v2  ;;  %s827_s6 = sadd.s32 %s959_s11, %s954_s24  ;;  %s830_s18 = sshll.u32 %s1776_s27, 4  ;;  %s1844_s18 = int_to_ptr.vmem [resolvable:$true] %s830_s18 }
  0x48   : > { %965 = vmatmul.mubr.msk.f32.vlgmr.msra.gmra.mrb[0].mxu0 %vm216_vm2, %v209_v3  ;;  %933 = vmatprep.subr.msk.mxu0 %vm220_vm1, %v327_v6  ;;  %s955_s30 = sshll.u32 %s827_s6, 7  ;;  %s1852_s15 = scalar_lea.sflag [#allocation4], %s198_s23 }
  0x49   : > { %444 = vmatprep.mubr.f32.mxu0 %v1329_v0  ;;  %967 = vmatprep.subr.msk.mxu1 %vm220_vm1, %v327_v6  ;;  %s1842_s4 = scalar_lea.hbm %s1916_s3, %s955_s30  ;;  %s1204_s5 = scalar_lea.vmem %s1844_s18, 4096 }
  0x4a   : > { %934 = vmatpush1.msk.msra.mxu0 %vm220_vm1, %v202_v5  ;;  %968 = vmatpush1.msk.msra.mxu1 %vm220_vm1, %v202_v5  ;;  %p1205_p7 = scmp.ne.s32.totalorder %s1844_s18, %s1204_s5  ;;  %p1927_p12 = scmp.ne.s32.totalorder %s1922_s7, 0 }
  0x4b   : > { %s1332_s26 = smov [#allocation5]  }
  0x4c   : > { %p1206_p2 = pnand %p1205_p7, %p1927_p12  ;;  %s1208_s28 = sshll.u32 %s1332_s26, 4  ;;  %s1209_s28 = int_to_ptr.vmem [resolvable:$false] %s1208_s28 }
  0x4d   : > { %s1210_s11 = scalar_lea.vmem %s1209_s28, 8192  ;;  %p1211_p11 = scmp.lt.s32.totalorder %s1844_s18, %s1209_s28 }
  0x4e   : > { %p1207_p4 = pneg %p1206_p2  ;;  %p1212_p1 = scmp.lt.s32.totalorder %s1210_s11, %s1204_s5 }
  0x50   : > { %p1213_p8 = por %p1212_p1, %p1211_p11 }
  0x52   : > { %p1214_p10 = pnand %p1213_p8, %p1207_p4 }
  0xc4   : > { %v214_v7 = vpop.permute.xlu0 %213 }
 0x11b   : > { %v290_v8 = vpop.f32.mrb[0].mxu0 }
 0x11c   : > { %v291_v9 = vadd.f32 %v290_v8, %v214_v7  ;;  %v966_v10 = vpop.f32.mrb[1].mxu0 }
 0x11e   : > { %294 = vxpose.xlu0.b32.start.end [1/1] (short) %v291_v9, 128 }
 0x19e   : > { %v310_v11 = vpop.trf.xlu0 }
 0x19f   : > { %935 = vmatmul.mubr.msk.f32.vlgmr.msra.gmra.mrb[2].mxu0 %vm216_vm2, %v310_v11 }
 0x1a0   : > { %450 = vmatprep.mubr.f32.mxu0 %v1329_v0 }
 0x1a2   : > { %v311_v12 = vpop.trf.xlu0 }
 0x1a3   : > { %936 = vmatmul.mubr.msk.f32.gmra.mrb[4].mxu0 %vm216_vm2, %v311_v12 }
 0x1a4   : > { %456 = vmatprep.mubr.f32.mxu0 %v1329_v0 }
 0x1a6   : > { %v312_v13 = vpop.trf.xlu0 }
 0x1a7   : > { %937 = vmatmul.mubr.msk.f32.gmra.mrb[6].mxu0 %vm216_vm2, %v312_v13 }
 0x1a8   : > { %462 = vmatprep.mubr.f32.mxu0 %v1329_v0 }
 0x1aa   : > { %v313_v14 = vpop.trf.xlu0 }
 0x1ab   : > { %938 = vmatmul.mubr.msk.f32.gmra.mrb[8].mxu0 %vm216_vm2, %v313_v14 }
 0x1ac   : > { %468 = vmatprep.mubr.f32.mxu0 %v1329_v0 }
 0x1ae   : > { %v314_v15 = vpop.trf.xlu0 }
 0x1af   : > { %939 = vmatmul.mubr.msk.f32.gmra.mrb[10].mxu0 %vm216_vm2, %v314_v15 }
 0x1b0   : > { %474 = vmatprep.mubr.f32.mxu0 %v1329_v0 }
 0x1b2   : > { %v315_v16 = vpop.trf.xlu0 }
 0x1b3   : > { %940 = vmatmul.mubr.msk.f32.gmra.mrb[12].mxu0 %vm216_vm2, %v315_v16 }
 0x1b4   : > { %480 = vmatprep.mubr.f32.mxu0 %v1329_v0 }
 0x1b6   : > { %v316_v17 = vpop.trf.xlu0 }
 0x1b7   : > { %941 = vmatmul.mubr.msk.f32.gmra.mrb[14].mxu0 %vm216_vm2, %v316_v17 }
 0x1ba   : > { %v317_v18 = vpop.trf.xlu0 }
 0x1bb   : > { %942 = vmatmul.mubr.msk.f32.vlgmr.msra.gmra.mrb[0].mxu1 %vm216_vm2, %v317_v18 }
 0x1bc   : > { %492 = vmatprep.mubr.f32.mxu1 %v1329_v0 }
 0x1be   : > { %v318_v19 = vpop.trf.xlu0 }
 0x1bf   : > { %943 = vmatmul.mubr.msk.f32.gmra.mrb[2].mxu1 %vm216_vm2, %v318_v19 }
 0x1c0   : > { %498 = vmatprep.mubr.f32.mxu1 %v1329_v0 }
 0x1c2   : > { %v319_v20 = vpop.trf.xlu0 }
 0x1c3   : > { %944 = vmatmul.mubr.msk.f32.gmra.mrb[4].mxu1 %vm216_vm2, %v319_v20 }
 0x1c4   : > { %504 = vmatprep.mubr.f32.mxu1 %v1329_v0 }
 0x1c6   : > { %v320_v21 = vpop.trf.xlu0 }
 0x1c7   : > { %945 = vmatmul.mubr.msk.f32.gmra.mrb[6].mxu1 %vm216_vm2, %v320_v21 }
 0x1c8   : > { %510 = vmatprep.mubr.f32.mxu1 %v1329_v0 }
 0x1ca   : > { %v321_v22 = vpop.trf.xlu0 }
 0x1cb   : > { %946 = vmatmul.mubr.msk.f32.gmra.mrb[8].mxu1 %vm216_vm2, %v321_v22 }
 0x1cc   : > { %516 = vmatprep.mubr.f32.mxu1 %v1329_v0 }
 0x1ce   : > { %v322_v23 = vpop.trf.xlu0 }
 0x1cf   : > { %947 = vmatmul.mubr.msk.f32.gmra.mrb[10].mxu1 %vm216_vm2, %v322_v23 }
 0x1d0   : > { %522 = vmatprep.mubr.f32.mxu1 %v1329_v0 }
 0x1d2   : > { %v323_v24 = vpop.trf.xlu0 }
 0x1d3   : > { %948 = vmatmul.mubr.msk.f32.gmra.mrb[12].mxu1 %vm216_vm2, %v323_v24 }
 0x1d4   : > { %528 = vmatprep.mubr.f32.mxu1 %v1329_v0 }
 0x1d6   : > { %v324_v25 = vpop.trf.xlu0 }
 0x1d7   : > { %949 = vmatmul.mubr.msk.f32.gmra.mrb[14].mxu1 %vm216_vm2, %v324_v25 }
 0x1d8   : > { %534 = vmatprep.mubr.f32.mxu1 %v1329_v0 }
 0x1da   : > { %v325_v26 = vpop.trf.xlu0 }
 0x1db   : > { %950 = vmatmul.mubr.msk.f32.gmra.mrb[16].mxu1 %vm216_vm2, %v325_v26 }
 0x272   : > { %v1547_v27 = vpop.f32.mrb[2].mxu0 }
 0x273   : > { %v1549_v28 = vpop.f32.mrb[3].mxu0 }
 0x274   : > { %v541_v29 = vmax.f32 %v1547_v27, %v1549_v28 }
 0x276   : > { %542 = vmax.xlane.f32.xlu1 %v541_v29  ;;  %v1553_v30 = vpop.f32.mrb[4].mxu0 }
 0x277   : > { %v1555_v31 = vpop.f32.mrb[5].mxu0 }
 0x278   : > { %v544_v32 = vmax.f32 %v1553_v30, %v1555_v31 }
 0x27a   : > { %545 = vmax.xlane.f32.xlu1 %v544_v32  ;;  %v1559_v33 = vpop.f32.mrb[6].mxu0 }
 0x27b   : > { %v1561_v34 = vpop.f32.mrb[7].mxu0 }
 0x27c   : > { %v547_v35 = vmax.f32 %v1559_v33, %v1561_v34 }
 0x27e   : > { %548 = vmax.xlane.f32.xlu1 %v547_v35  ;;  %v1565_v36 = vpop.f32.mrb[8].mxu0 }
 0x27f   : > { %v1567_v37 = vpop.f32.mrb[9].mxu0 }
 0x280   : > { %v550_v38 = vmax.f32 %v1565_v36, %v1567_v37 }
 0x282   : > { %551 = vmax.xlane.f32.xlu1 %v550_v38  ;;  %v1571_v39 = vpop.f32.mrb[10].mxu0 }
 0x283   : > { %v1573_v40 = vpop.f32.mrb[11].mxu0 }
 0x284   : > { %v553_v41 = vmax.f32 %v1571_v39, %v1573_v40 }
 0x286   : > { %554 = vmax.xlane.f32.xlu1 %v553_v41  ;;  %v1577_v42 = vpop.f32.mrb[12].mxu0 }
 0x287   : > { %v1579_v43 = vpop.f32.mrb[13].mxu0 }
 0x288   : > { %v556_v44 = vmax.f32 %v1577_v42, %v1579_v43 }
 0x28a   : > { %557 = vmax.xlane.f32.xlu1 %v556_v44  ;;  %v1583_v45 = vpop.f32.mrb[14].mxu0 }
 0x28b   : > { %v1585_v46 = vpop.f32.mrb[15].mxu0 }
 0x28c   : > { %v559_v47 = vmax.f32 %v1583_v45, %v1585_v46 }
 0x28e   : > { %v1589_v48 = vpop.f32.mrb[0].mxu1  ;;  %560 = vmax.xlane.f32.xlu1 %v559_v47 }
 0x28f   : > { %v1591_v49 = vpop.f32.mrb[1].mxu1 }
 0x290   : > { %v562_v50 = vmax.f32 %v1589_v48, %v1591_v49 }
 0x292   : > { %v1595_v51 = vpop.f32.mrb[2].mxu1  ;;  %563 = vmax.xlane.f32.xlu1 %v562_v50 }
 0x293   : > { %v1597_v52 = vpop.f32.mrb[3].mxu1 }
 0x294   : > { %v565_v53 = vmax.f32 %v1595_v51, %v1597_v52 }
 0x296   : > { %v1601_v54 = vpop.f32.mrb[4].mxu1  ;;  %566 = vmax.xlane.f32.xlu1 %v565_v53 }
 0x297   : > { %v1603_v55 = vpop.f32.mrb[5].mxu1 }
 0x298   : > { %v568_v56 = vmax.f32 %v1601_v54, %v1603_v55 }
 0x29a   : > { %569 = vmax.xlane.f32.xlu0 %v568_v56  ;;  %v1607_v57 = vpop.f32.mrb[6].mxu1 }
 0x29b   : > { %v1609_v58 = vpop.f32.mrb[7].mxu1 }
 0x29c   : > { %v571_v59 = vmax.f32 %v1607_v57, %v1609_v58 }
 0x29e   : > { %v1613_v60 = vpop.f32.mrb[8].mxu1  ;;  %572 = vmax.xlane.f32.xlu1 %v571_v59 }
 0x29f   : > { %v1615_v61 = vpop.f32.mrb[9].mxu1 }
 0x2a0   : > { %v574_v62 = vmax.f32 %v1613_v60, %v1615_v61 }
 0x2a2   : > { %v1619_v63 = vpop.f32.mrb[10].mxu1  ;;  %575 = vmax.xlane.f32.xlu1 %v574_v62 }
 0x2a3   : > { %v1621_v0 = vpop.f32.mrb[11].mxu1 }
 0x2a4   : > { %v577_v1 = vmax.f32 %v1619_v63, %v1621_v0 }
 0x2a6   : > { %v1625_v2 = vpop.f32.mrb[12].mxu1  ;;  %578 = vmax.xlane.f32.xlu1 %v577_v1 }
 0x2a7   : > { %v1627_v3 = vpop.f32.mrb[13].mxu1 }
 0x2a8   : > { %v580_v4 = vmax.f32 %v1625_v2, %v1627_v3 }
 0x2aa   : > { %v1631_v5 = vpop.f32.mrb[14].mxu1  ;;  %581 = vmax.xlane.f32.xlu1 %v580_v4 }
 0x2ab   : > { %v1633_v6 = vpop.f32.mrb[15].mxu1 }
 0x2ac   : > { %v583_v7 = vmax.f32 %v1631_v5, %v1633_v6 }
 0x2ae   : > { %v1637_v8 = vpop.f32.mrb[16].mxu1  ;;  %584 = vmax.xlane.f32.xlu1 %v583_v7 }
 0x2af   : > { %v1639_v9 = vpop.f32.mrb[17].mxu1 }
 0x2b0   : > { %v586_v10 = vmax.f32 %v1637_v8, %v1639_v9 }
 0x2b2   : > { %587 = vmax.xlane.f32.xlu1 %v586_v10 }
 0x303   : > { %v543_v11 = vpop.xlane.xlu1 %542 }
 0x304   : > { %v589_v12 = vsub.f32 %v1547_v27, %v543_v11  ;;  %v590_v13 = vsub.f32 %v1549_v28, %v543_v11 }
 0x306   : > { %v621_v14 = vmul.f32 1.442695, %v589_v12  ;;  %v623_v15 = vmul.f32 1.442695, %v590_v13 }
 0x307   : > { %v546_v16 = vpop.xlane.xlu1 %545 }
 0x308   : > { %1078 = vpow2.f32 %v621_v14  ;;  %v591_v17 = vsub.f32 %v1553_v30, %v546_v16  ;;  %v592_v18 = vsub.f32 %v1555_v31, %v546_v16 }
 0x309   : > { %1080 = vpow2.f32 %v623_v15 }
 0x30a   : > { %v625_v19 = vmul.f32 1.442695, %v591_v17  ;;  %v627_v20 = vmul.f32 1.442695, %v592_v18 }
 0x30b   : > { %v549_v21 = vpop.xlane.xlu1 %548 }
 0x30c   : > { %1082 = vpow2.f32 %v625_v19  ;;  %v593_v22 = vsub.f32 %v1559_v33, %v549_v21  ;;  %v594_v23 = vsub.f32 %v1561_v34, %v549_v21 }
 0x30d   : > { %1084 = vpow2.f32 %v627_v20 }
 0x30e   : > { %v629_v24 = vmul.f32 1.442695, %v593_v22  ;;  %v631_v25 = vmul.f32 1.442695, %v594_v23 }
 0x30f   : > { %v552_v26 = vpop.xlane.xlu1 %551 }
 0x310   : > { %1086 = vpow2.f32 %v629_v24  ;;  %v595_v27 = vsub.f32 %v1565_v36, %v552_v26  ;;  %v596_v28 = vsub.f32 %v1567_v37, %v552_v26 }
 0x311   : > { %1088 = vpow2.f32 %v631_v25 }
 0x312   : > { %v1651_v29 = vpop.eup %1078  ;;  %v633_v30 = vmul.f32 1.442695, %v595_v27  ;;  %v635_v31 = vmul.f32 1.442695, %v596_v28 }
 0x313   : > { %v1653_v32 = vpop.eup %1080  ;;  %v555_v35 = vpop.xlane.xlu1 %554 }
 0x314   : > { %1090 = vpow2.f32 %v633_v30  ;;  %v597_v33 = vsub.f32 %v1571_v39, %v555_v35  ;;  %v598_v34 = vsub.f32 %v1573_v40, %v555_v35  ;;  %v685_v38 = vadd.f32 %v1653_v32, %v1651_v29 }
 0x315   : > { %1092 = vpow2.f32 %v635_v31 }
 0x316   : > { %v1659_v36 = vpop.eup %1082  ;;  %v637_v37 = vmul.f32 1.442695, %v597_v33  ;;  %v639_v41 = vmul.f32 1.442695, %v598_v34  ;;  %686 = vadd.xlane.f32.xlu1 %v685_v38 }
 0x317   : > { %v1661_v44 = vpop.eup %1084  ;;  %v558_v47 = vpop.xlane.xlu1 %557 }
 0x318   : > { %1094 = vpow2.f32 %v637_v37  ;;  %v599_v50 = vsub.f32 %v1577_v42, %v558_v47  ;;  %v600_v53 = vsub.f32 %v1579_v43, %v558_v47  ;;  %v688_v39 = vadd.f32 %v1661_v44, %v1659_v36 }
 0x319   : > { %1096 = vpow2.f32 %v639_v41 }
 0x31a   : > { %v1667_v40 = vpop.eup %1086  ;;  %v641_v56 = vmul.f32 1.442695, %v599_v50  ;;  %v643_v59 = vmul.f32 1.442695, %v600_v53  ;;  %689 = vadd.xlane.f32.xlu1 %v688_v39 }
 0x31b   : > { %v1669_v62 = vpop.eup %1088  ;;  %v561_v1 = vpop.xlane.xlu1 %560 }
 0x31c   : > { %1098 = vpow2.f32 %v641_v56  ;;  %v601_v4 = vsub.f32 %v1583_v45, %v561_v1  ;;  %v602_v7 = vsub.f32 %v1585_v46, %v561_v1  ;;  %v691_v42 = vadd.f32 %v1669_v62, %v1667_v40 }
 0x31d   : > { %1100 = vpow2.f32 %v643_v59 }
 0x31e   : > { %v1675_v43 = vpop.eup %1090  ;;  %v645_v10 = vmul.f32 1.442695, %v601_v4  ;;  %v647_v11 = vmul.f32 1.442695, %v602_v7  ;;  %692 = vadd.xlane.f32.xlu1 %v691_v42 }
 0x31f   : > { %v1677_v12 = vpop.eup %1092  ;;  %v564_v13 = vpop.xlane.xlu1 %563 }
 0x320   : > { %1102 = vpow2.f32 %v645_v10  ;;  %v603_v14 = vsub.f32 %v1589_v48, %v564_v13  ;;  %v604_v15 = vsub.f32 %v1591_v49, %v564_v13  ;;  %v694_v45 = vadd.f32 %v1677_v12, %v1675_v43 }
 0x321   : > { %1104 = vpow2.f32 %v647_v11 }
 0x322   : > { %v1683_v46 = vpop.eup %1094  ;;  %v649_v16 = vmul.f32 1.442695, %v603_v14  ;;  %v651_v17 = vmul.f32 1.442695, %v604_v15  ;;  %695 = vadd.xlane.f32.xlu1 %v694_v45 }
 0x323   : > { %v1685_v18 = vpop.eup %1096  ;;  %v567_v19 = vpop.xlane.xlu1 %566 }
 0x324   : > { %1106 = vpow2.f32 %v649_v16  ;;  %v605_v20 = vsub.f32 %v1595_v51, %v567_v19  ;;  %v606_v21 = vsub.f32 %v1597_v52, %v567_v19  ;;  %v697_v48 = vadd.f32 %v1685_v18, %v1683_v46 }
 0x325   : > { %1108 = vpow2.f32 %v651_v17 }
 0x326   : > { %v1691_v49 = vpop.eup %1098  ;;  %v653_v22 = vmul.f32 1.442695, %v605_v20  ;;  %v655_v23 = vmul.f32 1.442695, %v606_v21  ;;  %698 = vadd.xlane.f32.xlu1 %v697_v48 }
 0x327   : > { %v1693_v24 = vpop.eup %1100  ;;  %v570_v25 = vpop.xlane.xlu0 %569 }
 0x328   : > { %1110 = vpow2.f32 %v653_v22  ;;  %v607_v26 = vsub.f32 %v1601_v54, %v570_v25  ;;  %v608_v27 = vsub.f32 %v1603_v55, %v570_v25  ;;  %v700_v51 = vadd.f32 %v1693_v24, %v1691_v49 }
 0x329   : > { %1112 = vpow2.f32 %v655_v23 }
 0x32a   : > { %v1699_v52 = vpop.eup %1102  ;;  %v657_v28 = vmul.f32 1.442695, %v607_v26  ;;  %v659_v30 = vmul.f32 1.442695, %v608_v27  ;;  %701 = vadd.xlane.f32.xlu1 %v700_v51 }
 0x32b   : > { %v1701_v31 = vpop.eup %1104  ;;  %v573_v35 = vpop.xlane.xlu1 %572 }
 0x32c   : > { %1114 = vpow2.f32 %v657_v28  ;;  %v609_v33 = vsub.f32 %v1607_v57, %v573_v35  ;;  %v610_v34 = vsub.f32 %v1609_v58, %v573_v35  ;;  %v703_v54 = vadd.f32 %v1701_v31, %v1699_v52 }
 0x32d   : > { %1116 = vpow2.f32 %v659_v30 }
 0x32e   : > { %v1707_v55 = vpop.eup %1106  ;;  %v661_v38 = vmul.f32 1.442695, %v609_v33  ;;  %v663_v37 = vmul.f32 1.442695, %v610_v34  ;;  %704 = vadd.xlane.f32.xlu1 %v703_v54 }
 0x32f   : > { %v1709_v41 = vpop.eup %1108  ;;  %v576_v47 = vpop.xlane.xlu1 %575 }
 0x330   : > { %1118 = vpow2.f32 %v661_v38  ;;  %v611_v50 = vsub.f32 %v1613_v60, %v576_v47  ;;  %v612_v53 = vsub.f32 %v1615_v61, %v576_v47  ;;  %v706_v57 = vadd.f32 %v1709_v41, %v1707_v55 }
 0x331   : > { %1120 = vpow2.f32 %v663_v37 }
 0x332   : > { %v1715_v58 = vpop.eup %1110  ;;  %v665_v39 = vmul.f32 1.442695, %v611_v50  ;;  %v667_v56 = vmul.f32 1.442695, %v612_v53  ;;  %707 = vadd.xlane.f32.xlu1 %v706_v57 }
 0x333   : > { %v1717_v59 = vpop.eup %1112  ;;  %v579_v1 = vpop.xlane.xlu1 %578 }
 0x334   : > { %1122 = vpow2.f32 %v665_v39  ;;  %v613_v4 = vsub.f32 %v1619_v63, %v579_v1  ;;  %v614_v7 = vsub.f32 %v1621_v0, %v579_v1  ;;  %v709_v60 = vadd.f32 %v1717_v59, %v1715_v58 }
 0x335   : > { %1124 = vpow2.f32 %v667_v56 }
 0x336   : > { %v1723_v61 = vpop.eup %1114  ;;  %v669_v42 = vmul.f32 1.442695, %v613_v4  ;;  %v671_v10 = vmul.f32 1.442695, %v614_v7  ;;  %710 = vadd.xlane.f32.xlu1 %v709_v60 }
 0x337   : > { %v1725_v11 = vpop.eup %1116  ;;  %v582_v13 = vpop.xlane.xlu1 %581 }
 0x338   : > { %1126 = vpow2.f32 %v669_v42  ;;  %v615_v14 = vsub.f32 %v1625_v2, %v582_v13  ;;  %v616_v15 = vsub.f32 %v1627_v3, %v582_v13  ;;  %v712_v63 = vadd.f32 %v1725_v11, %v1723_v61 }
 0x339   : > { %1128 = vpow2.f32 %v671_v10 }
 0x33a   : > { %v1731_v0 = vpop.eup %1118  ;;  %v673_v45 = vmul.f32 1.442695, %v615_v14  ;;  %v675_v16 = vmul.f32 1.442695, %v616_v15  ;;  %713 = vadd.xlane.f32.xlu1 %v712_v63 }
 0x33b   : > { %v1733_v17 = vpop.eup %1120  ;;  %v585_v19 = vpop.xlane.xlu1 %584 }
 0x33c   : > { %1130 = vpow2.f32 %v673_v45  ;;  %v617_v20 = vsub.f32 %v1631_v5, %v585_v19  ;;  %v618_v21 = vsub.f32 %v1633_v6, %v585_v19  ;;  %v715_v2 = vadd.f32 %v1733_v17, %v1731_v0 }
 0x33d   : > { %1132 = vpow2.f32 %v675_v16 }
 0x33e   : > { %v1739_v3 = vpop.eup %1122  ;;  %v677_v48 = vmul.f32 1.442695, %v617_v20  ;;  %v679_v22 = vmul.f32 1.442695, %v618_v21  ;;  %716 = vadd.xlane.f32.xlu1 %v715_v2 }
 0x33f   : > { %v1741_v23 = vpop.eup %1124  ;;  %v588_v25 = vpop.xlane.xlu1 %587 }
 0x340   : > { %1134 = vpow2.f32 %v677_v48  ;;  %v619_v26 = vsub.f32 %v1637_v8, %v588_v25  ;;  %v620_v27 = vsub.f32 %v1639_v9, %v588_v25  ;;  %v718_v5 = vadd.f32 %v1741_v23, %v1739_v3 }
 0x341   : > { %1136 = vpow2.f32 %v679_v22 }
 0x342   : > { %v1747_v6 = vpop.eup %1126  ;;  %v681_v51 = vmul.f32 1.442695, %v619_v26  ;;  %v683_v28 = vmul.f32 1.442695, %v620_v27  ;;  %719 = vadd.xlane.f32.xlu1 %v718_v5 }
 0x343   : > { %v1749_v30 = vpop.eup %1128 }
 0x344   : > { %1138 = vpow2.f32 %v681_v51  ;;  %v721_v35 = vadd.f32 %v1749_v30, %v1747_v6 }
 0x345   : > { %1140 = vpow2.f32 %v683_v28 }
 0x346   : > { %v1753_v33 = vpop.eup %1130  ;;  %722 = vadd.xlane.f32.xlu1 %v721_v35 }
 0x347   : > { %v1755_v8 = vpop.eup %1132 }
 0x348   : > { %v724_v9 = vadd.f32 %v1755_v8, %v1753_v33 }
 0x34a   : > { %v1759_v34 = vpop.eup %1134  ;;  %725 = vadd.xlane.f32.xlu1 %v724_v9 }
 0x34b   : > { %v1761_v54 = vpop.eup %1136 }
 0x34c   : > { %v727_v38 = vadd.f32 %v1761_v54, %v1759_v34 }
 0x34e   : > { %v1765_v37 = vpop.eup %1138  ;;  %728 = vadd.xlane.f32.xlu1 %v727_v38 }
 0x34f   : > { %v1767_v47 = vpop.eup %1140 }
 0x350   : > { %v730_v50 = vadd.f32 %v1767_v47, %v1765_v37 }
 0x352   : > { %731 = vadd.xlane.f32.xlu1 %v730_v50 }
 0x3a3   : > { %v687_v53 = vpop.xlane.xlu1 %686 }
 0x3a4   : > { %1142 = vrcp.f32 %v687_v53 }
 0x3a7   : > { %v690_v57 = vpop.xlane.xlu1 %689 }
 0x3a8   : > { %1144 = vrcp.f32 %v690_v57 }
 0x3ab   : > { %v693_v39 = vpop.xlane.xlu1 %692 }
 0x3ac   : > { %1146 = vrcp.f32 %v693_v39 }
 0x3ae   : > { %v1143_v56 = vpop.eup %1142 }
 0x3af   : > { %v749_v1 = vmul.f32 %v1143_v56, %v1651_v29  ;;  %v750_v4 = vmul.f32 %v1143_v56, %v1653_v32  ;;  %v696_v7 = vpop.xlane.xlu1 %695 }
 0x3b0   : > { %1148 = vrcp.f32 %v696_v7 }
 0x3b1   : > { %781 = vst [vmem:[%s1776_s27] sm:$0xff] %v749_v1  ;;  %782 = vst [vmem:[%s1776_s27 + $0x8] sm:$0xff] %v750_v4 }
 0x3b2   : > { %v1145_v60 = vpop.eup %1144 }
 0x3b3   : > { %v751_v42 = vmul.f32 %v1145_v60, %v1659_v36  ;;  %v752_v10 = vmul.f32 %v1145_v60, %v1661_v44  ;;  %v699_v29 = vpop.xlane.xlu1 %698 }
 0x3b4   : > { %1150 = vrcp.f32 %v699_v29 }
 0x3b5   : > { %783 = vst [vmem:[%s1776_s27 + $0x10] sm:$0xff] %v751_v42  ;;  %784 = vst [vmem:[%s1776_s27 + $0x18] sm:$0xff] %v752_v10 }
 0x3b6   : > { %v1147_v32 = vpop.eup %1146 }
 0x3b7   : > { %v753_v13 = vmul.f32 %v1147_v32, %v1667_v40  ;;  %v754_v14 = vmul.f32 %v1147_v32, %v1669_v62  ;;  %v702_v15 = vpop.xlane.xlu1 %701 }
 0x3b8   : > { %1152 = vrcp.f32 %v702_v15 }
 0x3b9   : > { %785 = vst [vmem:[%s1776_s27 + $0x20] sm:$0xff] %v753_v13  ;;  %786 = vst [vmem:[%s1776_s27 + $0x28] sm:$0xff] %v754_v14 }
 0x3ba   : > { %v1149_v36 = vpop.eup %1148 }
 0x3bb   : > { %v755_v44 = vmul.f32 %v1149_v36, %v1675_v43  ;;  %v756_v63 = vmul.f32 %v1149_v36, %v1677_v12  ;;  %v705_v45 = vpop.xlane.xlu1 %704 }
 0x3bc   : > { %1154 = vrcp.f32 %v705_v45 }
 0x3bd   : > { %787 = vst [vmem:[%s1776_s27 + $0x30] sm:$0xff] %v755_v44  ;;  %788 = vst [vmem:[%s1776_s27 + $0x38] sm:$0xff] %v756_v63 }
 0x3be   : > { %v1151_v40 = vpop.eup %1150 }
 0x3bf   : > { %v757_v62 = vmul.f32 %v1151_v40, %v1683_v46  ;;  %v758_v16 = vmul.f32 %v1151_v40, %v1685_v18  ;;  %v708_v19 = vpop.xlane.xlu1 %707 }
 0x3c0   : > { %1156 = vrcp.f32 %v708_v19 }
 0x3c1   : > { %789 = vst [vmem:[%s1776_s27 + $0x40] sm:$0xff] %v757_v62  ;;  %790 = vst [vmem:[%s1776_s27 + $0x48] sm:$0xff] %v758_v16 }
 0x3c2   : > { %v1153_v43 = vpop.eup %1152 }
 0x3c3   : > { %v759_v12 = vmul.f32 %v1153_v43, %v1691_v49  ;;  %v760_v20 = vmul.f32 %v1153_v43, %v1693_v24  ;;  %v711_v21 = vpop.xlane.xlu1 %710 }
 0x3c4   : > { %1158 = vrcp.f32 %v711_v21 }
 0x3c5   : > { %791 = vst [vmem:[%s1776_s27 + $0x50] sm:$0xff] %v759_v12  ;;  %792 = vst [vmem:[%s1776_s27 + $0x58] sm:$0xff] %v760_v20 }
 0x3c6   : > { %v1155_v46 = vpop.eup %1154 }
 0x3c7   : > { %v761_v18 = vmul.f32 %v1155_v46, %v1699_v52  ;;  %v762_v2 = vmul.f32 %v1155_v46, %v1701_v31  ;;  %v714_v48 = vpop.xlane.xlu1 %713 }
 0x3c8   : > { %1160 = vrcp.f32 %v714_v48 }
 0x3c9   : > { %793 = vst [vmem:[%s1776_s27 + $0x60] sm:$0xff] %v761_v18  ;;  %794 = vst [vmem:[%s1776_s27 + $0x68] sm:$0xff] %v762_v2 }
 0x3ca   : > { %v1157_v49 = vpop.eup %1156 }
 0x3cb   : > { %v763_v24 = vmul.f32 %v1157_v49, %v1707_v55  ;;  %v764_v22 = vmul.f32 %v1157_v49, %v1709_v41  ;;  %v717_v25 = vpop.xlane.xlu1 %716 }
 0x3cc   : > { %1162 = vrcp.f32 %v717_v25 }
 0x3cd   : > { %795 = vst [vmem:[%s1776_s27 + $0x70] sm:$0xff] %v763_v24  ;;  %796 = vst [vmem:[%s1776_s27 + $0x78] sm:$0xff] %v764_v22 }
 0x3ce   : > { %v1159_v52 = vpop.eup %1158 }
 0x3cf   : > { %v765_v31 = vmul.f32 %v1159_v52, %v1715_v58  ;;  %v766_v26 = vmul.f32 %v1159_v52, %v1717_v59  ;;  %v720_v27 = vpop.xlane.xlu1 %719 }
 0x3d0   : > { %1164 = vrcp.f32 %v720_v27 }
 0x3d1   : > { %797 = vst [vmem:[%s1776_s27 + $0x80] sm:$0xff] %v765_v31  ;;  %798 = vst [vmem:[%s1776_s27 + $0x88] sm:$0xff] %v766_v26 }
 0x3d2   : > { %v1161_v55 = vpop.eup %1160 }
 0x3d3   : > { %v767_v41 = vmul.f32 %v1161_v55, %v1723_v61  ;;  %v768_v5 = vmul.f32 %v1161_v55, %v1725_v11  ;;  %v723_v51 = vpop.xlane.xlu1 %722 }
 0x3d4   : > { %1166 = vrcp.f32 %v723_v51 }
 0x3d5   : > { %799 = vst [vmem:[%s1776_s27 + $0x90] sm:$0xff] %v767_v41  ;;  %800 = vst [vmem:[%s1776_s27 + $0x98] sm:$0xff] %v768_v5 }
 0x3d6   : > { %v1163_v58 = vpop.eup %1162 }
 0x3d7   : > { %v769_v59 = vmul.f32 %v1163_v58, %v1731_v0  ;;  %v770_v28 = vmul.f32 %v1163_v58, %v1733_v17  ;;  %v726_v35 = vpop.xlane.xlu1 %725 }
 0x3d8   : > { %1168 = vrcp.f32 %v726_v35 }
 0x3d9   : > { %801 = vst [vmem:[%s1776_s27 + $0xa0] sm:$0xff] %v769_v59  ;;  %802 = vst [vmem:[%s1776_s27 + $0xa8] sm:$0xff] %v770_v28 }
 0x3da   : > { %v1165_v61 = vpop.eup %1164 }
 0x3db   : > { %v771_v11 = vmul.f32 %v1165_v61, %v1739_v3  ;;  %v772_v9 = vmul.f32 %v1165_v61, %v1741_v23  ;;  %v729_v38 = vpop.xlane.xlu1 %728 }
 0x3dc   : > { %1170 = vrcp.f32 %v729_v38 }
 0x3dd   : > { %803 = vst [vmem:[%s1776_s27 + $0xb0] sm:$0xff] %v771_v11  ;;  %804 = vst [vmem:[%s1776_s27 + $0xb8] sm:$0xff] %v772_v9 }
 0x3de   : > { %v1167_v0 = vpop.eup %1166 }
 0x3df   : > { %v773_v17 = vmul.f32 %v1167_v0, %v1747_v6  ;;  %v774_v50 = vmul.f32 %v1167_v0, %v1749_v30  ;;  %v732_v53 = vpop.xlane.xlu1 %731 }
 0x3e0   : > { %1172 = vrcp.f32 %v732_v53 }
 0x3e1   : > { %805 = vst [vmem:[%s1776_s27 + $0xc0] sm:$0xff] %v773_v17  ;;  %806 = vst [vmem:[%s1776_s27 + $0xc8] sm:$0xff] %v774_v50 }
 0x3e2   : > { %v1169_v3 = vpop.eup %1168 }
 0x3e3   : > { %v775_v23 = vmul.f32 %v1169_v3, %v1753_v33  ;;  %v776_v57 = vmul.f32 %v1169_v3, %v1755_v8 }
 0x3e5   : > { %807 = vst [vmem:[%s1776_s27 + $0xd0] sm:$0xff] %v775_v23  ;;  %808 = vst [vmem:[%s1776_s27 + $0xd8] sm:$0xff] %v776_v57 }
 0x3e6   : > { %v1171_v6 = vpop.eup %1170 }
 0x3e7   : > { %v777_v30 = vmul.f32 %v1171_v6, %v1759_v34  ;;  %v778_v39 = vmul.f32 %v1171_v6, %v1761_v54 }
 0x3e9   : > { %809 = vst [vmem:[%s1776_s27 + $0xe0] sm:$0xff] %v777_v30  ;;  %810 = vst [vmem:[%s1776_s27 + $0xe8] sm:$0xff] %v778_v39 }
 0x3ea   : > { %v1173_v56 = vpop.eup %1172 }
 0x3eb   : > { %v779_v33 = vmul.f32 %v1173_v56, %v1765_v37  ;;  %v780_v8 = vmul.f32 %v1173_v56, %v1767_v47 }
 0x3ed   : > { %811 = vst [vmem:[%s1776_s27 + $0xf0] sm:$0xff] %v779_v33  ;;  %812 = vst [vmem:[%s1776_s27 + $0xf8] sm:$0xff] %v780_v8 }
 0x3ee   : > { %1217 = shalt.err (!%p1214_p10)
}
 0x3ef   : > { %s1218_s23 = scalar_lea.hbm %s1842_s4, 4096  ;;  %s1222_s6 = scalar_lea.hbm %s1916_s3, 16384 }
 0x3f0   : > { %p1219_p3 = scmp.ne.s32.totalorder %s1842_s4, %s1218_s23  ;;  %p1223_p5 = scmp.lt.u32.totalorder %s1842_s4, %s1916_s3 }
 0x3f1   : > { %p1224_p6 = scmp.lt.u32.totalorder %s1222_s6, %s1218_s23  ;;  %p1226_p7 = scmp.lt.u32.totalorder %s1218_s23, %s1842_s4 }
 0x3f2   : > { %p1220_p13 = pnand %p1219_p3, %p1927_p12 }
 0x3f3   : > { %p1225_p9 = por %p1224_p6, %p1223_p5 }
 0x3f4   : > { %p1221_p0 = pneg %p1220_p13 }
 0x3f5   : > { %p1227_p2 = por %p1226_p7, %p1225_p9 }
 0x3f7   : > { %p1228_p4 = pnand %p1227_p2, %p1221_p0 }
 0x3f9   : > { %1231 = shalt.err (!%p1228_p4)
}
 0x3fa   : > { %s1333_s29 = smov 256   ;;  %s1334_s5 = smov 16  }
 0x3fb   : > { %971 = dma.vmem_to_hbm [thread:$0]  (%p1927_p12), %s1844_s18, 4096, %s1842_s4, %s1852_s15, %s1333_s29, %s1333_s29, %s1334_s5  }
 0x3fc PF: > { %p982_p11 = scmp.ge.s32.totalorder %s1326_s22, 2  ;;  %s845_s26 = sand.u32 1, %s1286_s12  }
 0x3fd   : > { %p1928_p1 = scmp.ne.s32.totalorder %s1923_s10, 0  ;;  %s846_s28 = scalar_lea.sflag [#allocation4], %s845_s26 }
 0x3ff   : > { %p978_p8 = pnand %p982_p11, %p1928_p1 }
 0x401   : > { %1281 = dma.done.wait (!%p978_p8), %s846_s28, 4096  }
 0x402   : > { %1283 = vsyncadd (!%p978_p8), %s846_s28, 4294963200  ;;  %s19_s22 = sadd.s32 1, %s1326_s22   ;;  %s1929_s7 = sld [smem:[#allocation8_spill]] }
 0x403   : > { %p16_p10 = scmp.ge.s32.totalorder %s19_s22, 6   ;;  %s1930_s12 = smov %s1290_s13 }
 0x404   : > { %s1931_s13 = smov %s1294_s14  ;;  %s1932_s14 = smov %s1445_s9 }
 0x405   : > { %s1933_s15 = smov %s1302_s16  ;;  %s1934_s16 = smov %s1306_s17 }
 0x406   : > { %s1935_s17 = smov %s1442_s8  ;;  %s1936_s18 = smov %s1318_s20 }
 0x407   : > { %s1937_s19 = smov %s1322_s21  ;;  %s1938_s20 = smov %s1941_s25 }
 0x408   : > { %s1939_s21 = smov %s1929_s7  ;;  %18 = sbr.rel (!%p16_p10) target bundleno = 9 (0x9), region = 78 }
 0x40f   :  { %851 = vsyncpa [#allocation3], 1 }
 0x410   :  { %853 = vsyncpa [#allocation3 + $0x1], 1 }
 0x411   :  { %854 = vsyncpa [#allocation4], 1 }
 0x412   :  { %856 = vsyncpa [#allocation4 + $0x1], 1 }

</bundles_post_ra>
